<compile_context>
chip_gen: v6e
topology: v6e:2x2x1
jax: 0.10.0
libtpu: 0.0.40
codegen_flags: <defaults>
</compile_context>

<pallas_src>
import functools

import jax
import jax.numpy as jnp
from jax.experimental import pallas as pl
from jax.experimental.pallas import tpu as pltpu

LANE = 128      # lane width (last dim)
SUBLANE = 8     # f32 sublane tile (second-to-last dim)


def _round_up(n, m):
    return ((n + m - 1) // m) * m


# --------------------------------------------------------------------------
# Kernel: whole MLP, statically unrolled.
#   x_ref  : (tb, F_in)            f32   (unpadded feature dim)
#   w0_ref : (F_in, D)             bf16  (first layer, N padded to D)
#   wr_ref : (L-1, D, D)           bf16  (remaining layers, packed)
#   b_ref  : (L, 1, D)             f32   (all biases, packed; BN pre-folded)
#   o_ref  : (tb, D)               f32
# --------------------------------------------------------------------------
def _mlp_kernel(x_ref, w0_ref, wr_ref, b_ref, o_ref, *, num_layers):
    h = jnp.dot(x_ref[...].astype(jnp.bfloat16), w0_ref[...],
                preferred_element_type=jnp.float32) + b_ref[0]
    for i in range(1, num_layers):
        # Hidden layer: ReLU.  Eval-mode BN affine is pre-folded into the
        # FOLLOWING layer's W/b; Dropout is identity in eval mode.
        h = jnp.maximum(h, 0.0)
        h = jnp.dot(h.astype(jnp.bfloat16), wr_ref[i - 1],
                    preferred_element_type=jnp.float32) + b_ref[i]
    o_ref[...] = h.astype(o_ref.dtype)


# --------------------------------------------------------------------------
# Wrapper: one pallas_call for the whole network, batch-tiled grid.
# --------------------------------------------------------------------------
def fused_mlp_forward(x, packed, *, block_b=1024):
    """x: (B, F_in).  packed: dict from prepare_params()."""
    bsz, f_in = x.shape
    assert f_in == packed["f_in"], "input feature size mismatch"
    d_pad = packed["d_pad"]
    num_layers = packed["num_layers"]

    # Batch tile: multiple of 8 (or the full batch when B < 8).  No padding /
    # copying of x: Pallas masks the ragged last tile's writeback.
    if bsz <= SUBLANE:
        tb = bsz
    else:
        tb = min(_round_up(block_b, SUBLANE), (bsz // SUBLANE) * SUBLANE)
        # v7x megacore: ensure a large batch produces >= 2 "parallel" steps.
        if bsz >= 256 and pl.cdiv(bsz, tb) < 2:
            tb = _round_up(pl.cdiv(bsz, 2), SUBLANE)
    grid = (pl.cdiv(bsz, tb),)

    w0, wr, b_all = packed["w0"], packed["w_rest"], packed["b"]

    flops = 2 * bsz * (f_in * d_pad + (num_layers - 1) * d_pad * d_pad)
    bytes_accessed = (bsz * f_in * 4            # x (f32)
                      + w0.size * 2 + wr.size * 2   # bf16 weights
                      + b_all.size * 4              # f32 biases
                      + bsz * d_pad * 4)            # output (f32)

    out = pl.pallas_call(
        functools.partial(_mlp_kernel, num_layers=num_layers),
        out_shape=jax.ShapeDtypeStruct((bsz, d_pad), jnp.float32),
        grid=grid,
        in_specs=[
            pl.BlockSpec((tb, f_in), lambda i: (i, 0)),
            pl.BlockSpec(w0.shape, lambda i: (0, 0)),
            pl.BlockSpec(wr.shape, lambda i: (0, 0, 0)),
            pl.BlockSpec(b_all.shape, lambda i: (0, 0, 0)),
        ],
        out_specs=pl.BlockSpec((tb, d_pad), lambda i: (i, 0)),
        compiler_params=pltpu.CompilerParams(
            dimension_semantics=("parallel",)),
        cost_estimate=pl.CostEstimate(
            flops=flops, transcendentals=0, bytes_accessed=bytes_accessed),
    )(jnp.asarray(x, jnp.float32), w0, wr, b_all)
    return out


def emotion_classifier_forward(x, packed, num_classes, *, block_b=1024):
    out = fused_mlp_forward(x, packed, block_b=block_b)
    return out[:, :num_classes]


# --------------------------------------------------------------------------
# Parameter prep (one-time): fold eval-mode BN into the following Linear,
# pad feature dims to the common lane width, pack into 3 arrays, cast weights
# to bf16.
# --------------------------------------------------------------------------
def prepare_params(params, eps=1e-5):
    # --- fold eval-mode BN (running stats) into the FOLLOWING Linear ---
    #   (relu(x@W0+b0)*s + t) @ W1 + b1
    #     == relu(x@W0+b0) @ (s[:,None]*W1) + (t@W1 + b1)
    folded = []
    pending_scale = pending_shift = None
    for layer in params:
        w = jnp.asarray(layer["w"], jnp.float32)
        b = jnp.asarray(layer["b"], jnp.float32)
        if pending_scale is not None:
            b = b + pending_shift @ w
            w = pending_scale[:, None] * w
        if layer["has_bn"]:
            s = layer["gamma"] * jax.lax.rsqrt(layer["var"] + eps)
            pending_scale = s
            pending_shift = layer["beta"] - layer["mean"] * s
        else:
            pending_scale = pending_shift = None
        folded.append((w, b))

    num_layers = len(folded)
    f_in = folded[0][0].shape[0]
    d_pad = max(_round_up(w.shape[1], LANE) for w, _ in folded)

    # First layer keeps its unpadded K dim (so x never needs a padding copy);
    # its N dim is padded to the common lane width D.
    w0 = jnp.zeros((f_in, d_pad), jnp.float32)
    w0 = w0.at[:, :folded[0][0].shape[1]].set(folded[0][0])

    # Remaining layers packed into one (L-1, D, D) array; all biases into one
    # (L, 1, D) array.  Zero padding is exact: padded columns stay 0 through
    # bias/ReLU and padded rows multiply those zeros.
    n_rest = max(num_layers - 1, 1)   # keep a dummy slab if there are no hidden layers
    wr = jnp.zeros((n_rest, d_pad, d_pad), jnp.float32)
    b_all = jnp.zeros((num_layers, 1, d_pad), jnp.float32)
    b_all = b_all.at[0, 0, :folded[0][1].shape[0]].set(folded[0][1])
    for i in range(1, num_layers):
        w, b = folded[i]
        wr = wr.at[i - 1, :w.shape[0], :w.shape[1]].set(w)
        b_all = b_all.at[i, 0, :b.shape[0]].set(b)

    return dict(
        w0=w0.astype(jnp.bfloat16),        # bf16 weights: half DMA, native MXU
        w_rest=wr.astype(jnp.bfloat16),
        b=b_all,                           # biases stay f32 (VPU add in f32)
        f_in=f_in,
        d_pad=d_pad,
        num_layers=num_layers,
    )


# --------------------------------------------------------------------------
# Synthetic parameters (shapes match nn.Module __init__) + pure-JAX reference.
# --------------------------------------------------------------------------
def init_emotion_classifier_params(key, input_size, hidden_sizes, num_classes):
    params = []
    prev = input_size
    dims = list(hidden_sizes) + [num_classes]
    for i, h in enumerate(dims):
        key, kw, kb, kg, kbeta, km, kv = jax.random.split(key, 7)
        w = jax.random.normal(kw, (prev, h), jnp.float32) * 0.05
        b = jax.random.normal(kb, (h,), jnp.float32) * 0.01
        if i < len(hidden_sizes):
            gamma = 1.0 + 0.1 * jax.random.normal(kg, (h,), jnp.float32)
            beta = 0.1 * jax.random.normal(kbeta, (h,), jnp.float32)
            run_mean = 0.05 * jax.random.normal(km, (h,), jnp.float32)
            run_var = 1.0 + 0.1 * jax.random.uniform(kv, (h,), jnp.float32)
            params.append(dict(w=w, b=b, gamma=gamma, beta=beta,
                               mean=run_mean, var=run_var, has_bn=True))
        else:
            params.append(dict(w=w, b=b, has_bn=False))
        prev = h
    return params


def reference_forward(x, params, eps=1e-5):
    """Pure-JAX reference: [Linear -> ReLU -> BN(running) -> Dropout(id)]* -> Linear."""
    h = x
    n = len(params)
    for idx, layer in enumerate(params):
        y = h @ layer["w"] + layer["b"]
        if idx < n - 1:
            y = jnp.maximum(y, 0.0)
            if layer["has_bn"]:
                y = (y - layer["mean"]) * jax.lax.rsqrt(layer["var"] + eps)
                y = y * layer["gamma"] + layer["beta"]
        h = y
    return h


if __name__ == "__main__":
    key = jax.random.PRNGKey(0)
    batch = 8
    input_size = 32
    hidden_sizes = [64, 32]
    num_classes = 8

    key, kx = jax.random.split(key)
    x = jax.random.normal(kx, (batch, input_size), jnp.float32)

    params = init_emotion_classifier_params(key, input_size, hidden_sizes,
                                            num_classes)
    packed = prepare_params(params)        # one-time BN fold + pack + bf16

    out = emotion_classifier_forward(x, packed, num_classes)
    out = jax.block_until_ready(out)

    ref = reference_forward(x, params)
    assert out.shape == (batch, num_classes)
    max_err = float(jnp.max(jnp.abs(out - ref)))
    # bf16 weights with f32 accumulation -> loosened tolerance vs f32 reference.
    assert jnp.allclose(out, ref, atol=3e-2, rtol=3e-2), max_err

    print("KERNEL_OK")
</pallas_src>

<mosaic_0001>
module attributes {stable_mosaic.version = 11 : i64} {
  func.func @_mlp_kernel(%arg0: i32, %arg1: memref<8x32xf32, #tpu.memory_space<vmem>>, %arg2: memref<32x128xbf16, #tpu.memory_space<vmem>>, %arg3: memref<2x128x128xbf16, #tpu.memory_space<vmem>>, %arg4: memref<3x1x128xf32, #tpu.memory_space<vmem>>, %arg5: memref<8x128xf32, #tpu.memory_space<vmem>>) attributes {dimension_semantics = [#tpu.dimension_semantics<parallel>], iteration_bounds = array<i64: 1>, scalar_prefetch = 0 : i64, scratch_operands = 0 : i64, tpu.core_type = #tpu.core_type<tc>, window_params = [{transform_indices = @transform_0, window_bounds = array<i64: 8, 32>}, {pipeline_mode = #tpu.pipeline_mode<synchronous>, transform_indices = @transform_1, window_bounds = array<i64: 32, 128>}, {pipeline_mode = #tpu.pipeline_mode<synchronous>, transform_indices = @transform_2, window_bounds = array<i64: 2, 128, 128>}, {pipeline_mode = #tpu.pipeline_mode<synchronous>, transform_indices = @transform_3, window_bounds = array<i64: 3, 1, 128>}, {transform_indices = @transform_4, window_bounds = array<i64: 8, 128>}]} {
    %c0 = arith.constant 0 : index
    %c0_0 = arith.constant 0 : index
    %0 = vector.load %arg1[%c0, %c0_0] : memref<8x32xf32, #tpu.memory_space<vmem>>, vector<8x32xf32>
    %1 = arith.truncf %0 : vector<8x32xf32> to vector<8x32xbf16>
    %c0_1 = arith.constant 0 : index
    %c0_2 = arith.constant 0 : index
    %2 = vector.load %arg2[%c0_1, %c0_2] : memref<32x128xbf16, #tpu.memory_space<vmem>>, vector<32x128xbf16>
    %cst = arith.constant dense<0.000000e+00> : vector<8x128xf32>
    %3 = tpu.matmul %1, %2, %cst {dimension_numbers = #tpu.dot_dimension_numbers<[1], [0], [0], [1], [0, 0, 1, 1], [], []>} : vector<8x32xbf16>, vector<32x128xbf16>, vector<8x128xf32> -> vector<8x128xf32>
    %c0_3 = arith.constant 0 : index
    %c0_4 = arith.constant 0 : index
    %c0_5 = arith.constant 0 : index
    %4 = vector.load %arg4[%c0_3, %c0_4, %c0_5] : memref<3x1x128xf32, #tpu.memory_space<vmem>>, vector<1x1x128xf32>
    %5 = vector.shape_cast %4 : vector<1x1x128xf32> to vector<1x128xf32>
    %6 = vector.broadcast %5 : vector<1x128xf32> to vector<8x128xf32>
    %7 = arith.addf %3, %6 : vector<8x128xf32>
    %cst_6 = arith.constant 0.000000e+00 : f32
    %8 = vector.broadcast %cst_6 : f32 to vector<8x128xf32>
    %9 = arith.maximumf %7, %8 : vector<8x128xf32>
    %10 = arith.truncf %9 : vector<8x128xf32> to vector<8x128xbf16>
    %c0_7 = arith.constant 0 : index
    %c0_8 = arith.constant 0 : index
    %c0_9 = arith.constant 0 : index
    %11 = vector.load %arg3[%c0_7, %c0_8, %c0_9] : memref<2x128x128xbf16, #tpu.memory_space<vmem>>, vector<1x128x128xbf16>
    %12 = vector.shape_cast %11 : vector<1x128x128xbf16> to vector<128x128xbf16>
    %cst_10 = arith.constant dense<0.000000e+00> : vector<8x128xf32>
    %13 = tpu.matmul %10, %12, %cst_10 {dimension_numbers = #tpu.dot_dimension_numbers<[1], [0], [0], [1], [0, 0, 1, 1], [], []>} : vector<8x128xbf16>, vector<128x128xbf16>, vector<8x128xf32> -> vector<8x128xf32>
    %c1 = arith.constant 1 : index
    %c0_11 = arith.constant 0 : index
    %c0_12 = arith.constant 0 : index
    %14 = vector.load %arg4[%c1, %c0_11, %c0_12] : memref<3x1x128xf32, #tpu.memory_space<vmem>>, vector<1x1x128xf32>
    %15 = vector.shape_cast %14 : vector<1x1x128xf32> to vector<1x128xf32>
    %16 = vector.broadcast %15 : vector<1x128xf32> to vector<8x128xf32>
    %17 = arith.addf %13, %16 : vector<8x128xf32>
    %cst_13 = arith.constant 0.000000e+00 : f32
    %18 = vector.broadcast %cst_13 : f32 to vector<8x128xf32>
    %19 = arith.maximumf %17, %18 : vector<8x128xf32>
    %20 = arith.truncf %19 : vector<8x128xf32> to vector<8x128xbf16>
    %c1_14 = arith.constant 1 : index
    %c0_15 = arith.constant 0 : index
    %c0_16 = arith.constant 0 : index
    %21 = vector.load %arg3[%c1_14, %c0_15, %c0_16] : memref<2x128x128xbf16, #tpu.memory_space<vmem>>, vector<1x128x128xbf16>
    %22 = vector.shape_cast %21 : vector<1x128x128xbf16> to vector<128x128xbf16>
    %cst_17 = arith.constant dense<0.000000e+00> : vector<8x128xf32>
    %23 = tpu.matmul %20, %22, %cst_17 {dimension_numbers = #tpu.dot_dimension_numbers<[1], [0], [0], [1], [0, 0, 1, 1], [], []>} : vector<8x128xbf16>, vector<128x128xbf16>, vector<8x128xf32> -> vector<8x128xf32>
    %c2 = arith.constant 2 : index
    %c0_18 = arith.constant 0 : index
    %c0_19 = arith.constant 0 : index
    %24 = vector.load %arg4[%c2, %c0_18, %c0_19] : memref<3x1x128xf32, #tpu.memory_space<vmem>>, vector<1x1x128xf32>
    %25 = vector.shape_cast %24 : vector<1x1x128xf32> to vector<1x128xf32>
    %26 = vector.broadcast %25 : vector<1x128xf32> to vector<8x128xf32>
    %27 = arith.addf %23, %26 : vector<8x128xf32>
    %c0_20 = arith.constant 0 : index
    %c0_21 = arith.constant 0 : index
    %28 = vector.load %arg5[%c0_20, %c0_21] : memref<8x128xf32, #tpu.memory_space<vmem>>, vector<8x128xf32>
    tpu.vector_store %arg5[%c0_20, %c0_21], %27 {strides = array<i32>} : memref<8x128xf32, #tpu.memory_space<vmem>>, vector<8x128xf32>,
    return
  }
  func.func @transform_0(%arg0: i32) -> (i32, i32) {
    %c0_i32 = arith.constant 0 : i32
    %c0_i32_0 = arith.constant 0 : i32
    return %arg0, %c0_i32 : i32, i32
  }
  func.func @transform_1(%arg0: i32) -> (i32, i32) {
    %c0_i32 = arith.constant 0 : i32
    %c0_i32_0 = arith.constant 0 : i32
    %c0_i32_1 = arith.constant 0 : i32
    return %c0_i32, %c0_i32_0 : i32, i32
  }
  func.func @transform_2(%arg0: i32) -> (i32, i32, i32) {
    %c0_i32 = arith.constant 0 : i32
    %c0_i32_0 = arith.constant 0 : i32
    %c0_i32_1 = arith.constant 0 : i32
    %c0_i32_2 = arith.constant 0 : i32
    return %c0_i32, %c0_i32_0, %c0_i32_1 : i32, i32, i32
  }
  func.func @transform_3(%arg0: i32) -> (i32, i32, i32) {
    %c0_i32 = arith.constant 0 : i32
    %c0_i32_0 = arith.constant 0 : i32
    %c0_i32_1 = arith.constant 0 : i32
    %c0_i32_2 = arith.constant 0 : i32
    return %c0_i32, %c0_i32_0, %c0_i32_1 : i32, i32, i32
  }
  func.func @transform_4(%arg0: i32) -> (i32, i32) {
    %c0_i32 = arith.constant 0 : i32
    %c0_i32_0 = arith.constant 0 : i32
    return %arg0, %c0_i32 : i32, i32
  }
}

</mosaic_0001>

<bundles_post_ra>
// kernel: tpu_custom_call.1
= control target key start
LH: loop header
LB: loop body
LE: loop exit
PB: predicated region body
PF: predicated region fallthrough
CT: control target
= control target key end

     0   :  { %9 = vsyncpa [#allocation3], 0  ;;  %s656_s0 = inlined_call_operand.hbm [shape: f32[8,32], index: 0, kind: input, shape index: {}]   ;;  %s657_s1 = inlined_call_operand.hbm [shape: bf16[32,128], index: 1, kind: input, shape index: {}]   ;;  %s658_s2 = inlined_call_operand.hbm [shape: bf16[2,128,128], index: 2, kind: input, shape index: {}]   ;;  %s659_s3 = inlined_call_operand.vmem [shape: f32[3,1,128], index: 3, kind: input, shape index: {}]   ;;  %s660_s4 = inlined_call_operand.hbm [shape: f32[8,128], index: 4, kind: output, shape index: {}]  }
   0x1   :  { %10 = vsyncpa [#allocation6], 0 }
   0x2   :  { %11 = vsyncpa [#allocation4], 0  ;;  %s578_s15 = smov [#allocation5]  }
   0x3   :  { %s27_s16 = sshll.u32 %s578_s15, 4  ;;  %s28_s16 = int_to_ptr.vmem [resolvable:$true] %s27_s16 }
   0x4   :  { %s500_s17 = scalar_lea.vmem %s28_s16, 256  ;;  %p505_p1 = scmp.lt.s32.totalorder %s28_s16, %s28_s16 }
   0x5   :  { %p501_p0 = scmp.ne.s32.totalorder %s28_s16, %s500_s17  ;;  %p506_p2 = scmp.lt.s32.totalorder %s500_s17, %s500_s17 }
   0x7   :  { %p507_p3 = por %p506_p2, %p505_p1 }
   0x9   :  { %p508_p4 = pnand %p507_p3, %p501_p0 }
   0xb   :  { %511 = shalt.err (!%p508_p4)
}
   0xc   :  { %s579_s18 = smov 64   ;;  %s580_s19 = smov 4  }
   0xd   :  { %33 = dma.hbm_to_vmem [thread:$0]  %s657_s1, 256, %s28_s16, [#allocation6], %s579_s18, %s579_s18, %s580_s19  }
   0xe   :  { %s581_s22 = smov [#allocation2]   ;;  %s582_s24 = smov [#allocation7]  }
   0xf   :  { %s18_s23 = sshll.u32 %s581_s22, 4  ;;  %s39_s25 = sshll.u32 %s582_s24, 4  ;;  %s19_s23 = int_to_ptr.vmem [resolvable:$true] %s18_s23  ;;  %s40_s25 = int_to_ptr.vmem [resolvable:$true] %s39_s25 }
  0x10   :  { %s520_s26 = scalar_lea.vmem %s19_s23, 128  ;;  %p525_p6 = scmp.lt.s32.totalorder %s19_s23, %s19_s23 }
  0x11   :  { %p521_p5 = scmp.ne.s32.totalorder %s19_s23, %s520_s26  ;;  %p526_p7 = scmp.lt.s32.totalorder %s520_s26, %s520_s26 }
  0x13   :  { %p527_p8 = por %p526_p7, %p525_p6 }
  0x15   :  { %p528_p9 = pnand %p527_p8, %p521_p5 }
  0x17   :  { %531 = shalt.err (!%p528_p9)
}
  0x18   :  { %21 = dma.hbm_to_vmem [thread:$0]  %s656_s0, 128, %s19_s23, [#allocation3]  }
  0x19   :  { %s540_s29 = scalar_lea.vmem %s40_s25, 2048  ;;  %p545_p11 = scmp.lt.s32.totalorder %s40_s25, %s40_s25 }
  0x1a   :  { %p541_p10 = scmp.ne.s32.totalorder %s40_s25, %s540_s29  ;;  %p546_p12 = scmp.lt.s32.totalorder %s540_s29, %s540_s29 }
  0x1c   :  { %p547_p13 = por %p546_p12, %p545_p11 }
  0x1e   :  { %p548_p0 = pnand %p547_p13, %p541_p10 }
  0x20   :  { %551 = shalt.err (!%p548_p0)
}
  0x21   :  { %45 = dma.hbm_to_vmem [thread:$0]  %s658_s2, 2048, %s40_s25, [#allocation6], %s579_s18, %s579_s18, %s580_s19  }
  0x22   :  { %572 = dma.done.wait [#allocation3], 128  }
  0x23   :  { %573 = vsyncadd [#allocation3], 4294967168 }
  0x24   :  { %574 = dma.done.wait [#allocation6], 2304  }
  0x25   :  { %575 = vsyncadd [#allocation6], 4294964992  ;;  %v583_v0 = vmov 0.0   ;;  %vm584_vm0 = vmmov 0   ;;  %v474_v1 = vld [vmem:[#allocation5 + $0x8] sm:$0xff]   ;;  %v475_v2 = vld [vmem:[#allocation5] sm:$0xff]  }
  0x26   :  { %418 = vmatprep.subr.bf16.mxu0 %v583_v0  ;;  %422 = vmatprep.mubr.msk.bf16.mxu0 %vm584_vm0, %v583_v0  ;;  %v58_v3 = vld [vmem:[#allocation2] sm:$0xff]  ;;  %v476_v4 = vld [vmem:[#allocation7 + $0x38] sm:$0xff]   ;;  %v477_v6 = vld [vmem:[#allocation7 + $0x30] sm:$0xff]   ;;  %vm83_vm1 = vcmask 261120   ;;  %s585_s9 = smov [#allocation8]  }
  0x27   :  { %426 = vmatprep.subr.bf16.mxu1 %v583_v0  ;;  %442 = vmatprep.mubr.msk.bf16.mxu1 %vm584_vm0, %v583_v0  ;;  %v59_v5 = vpack.c.bf16 %v58_v3, %v58_v3  ;;  %v478_v7 = vld [vmem:[#allocation7 + $0x28] sm:$0xff]   ;;  %v479_v8 = vld [vmem:[#allocation7 + $0x20] sm:$0xff]   ;;  %v480_v9 = vld [vmem:[#allocation7 + $0x18] sm:$0xff]   ;;  %s363_s10 = sshll.u32 %s585_s9, 4  ;;  %s364_s10 = int_to_ptr.vmem [resolvable:$true] %s363_s10 }
  0x28   :  { %419 = vmatpush3.bf16.msra.mxu0 %v474_v1  ;;  %427 = vmatpush3.bf16.msra.mxu1 %v476_v4  ;;  %v481_v10 = vld [vmem:[#allocation7 + $0x10] sm:$0xff]   ;;  %v482_v11 = vld [vmem:[#allocation7 + $0x8] sm:$0xff]   ;;  %v483_v12 = vld [vmem:[#allocation7] sm:$0xff]   ;;  %s552_s11 = scalar_lea.vmem %s364_s10, 128  ;;  %p557_p2 = scmp.lt.s32.totalorder %s364_s10, %s364_s10 }
  0x29   :  { %420 = vmatprep.subr.bf16.mxu0 %v583_v0  ;;  %428 = vmatprep.subr.bf16.mxu1 %v583_v0  ;;  %v484_v13 = vld [vmem:[#allocation7 + $0x78] sm:$0xff]   ;;  %v485_v14 = vld [vmem:[#allocation7 + $0x70] sm:$0xff]   ;;  %v486_v15 = vld [vmem:[#allocation7 + $0x68] sm:$0xff]   ;;  %p553_p1 = scmp.ne.s32.totalorder %s364_s10, %s552_s11  ;;  %p558_p3 = scmp.lt.s32.totalorder %s552_s11, %s552_s11 }
  0x2a   :  { %v487_v16 = vld [vmem:[#allocation7 + $0x60] sm:$0xff]   ;;  %v488_v17 = vld [vmem:[#allocation7 + $0x58] sm:$0xff]   ;;  %v489_v18 = vld [vmem:[#allocation7 + $0x50] sm:$0xff]  }
  0x2b   :  { %v373_v19 = vld [vmem:[%s659_s3] ss:$0 sm:$0xff]  ;;  %v491_v28 = vld [vmem:[#allocation7 + $0x40] sm:$0xff]   ;;  %v378_v29 = vld [vmem:[%s659_s3 + $0x1] ss:$0 sm:$0xff]  ;;  %p559_p4 = por %p558_p3, %p557_p2 }
  0x2c   :  { %421 = vmatpush3.bf16.msra.mxu0 %v475_v2  ;;  %429 = vmatpush3.bf16.msra.mxu1 %v477_v6  ;;  %v490_v27 = vld [vmem:[#allocation7 + $0x48] sm:$0xff]  }
  0x2d   :  { %446 = vmatprep.subr.bf16.mxu0 %v583_v0  ;;  %430 = vmatprep.subr.bf16.mxu1 %v583_v0  ;;  %v388_v37 = vld [vmem:[%s659_s3 + $0x2] ss:$0 sm:$0xff]  ;;  %p560_p5 = pnand %p559_p4, %p553_p1 }
  0x2f   :  { %423 = vmatmul.mubr.msk.bf16.vlgmr.msra.gmra.mxu0 %vm83_vm1, %v59_v5 }
  0x30   :  { %462 = vmatprep.mubr.msk.bf16.mxu0 %vm584_vm0, %v583_v0  ;;  %431 = vmatpush3.bf16.msra.mxu1 %v478_v7 }
  0x31   :  { %432 = vmatprep.subr.bf16.mxu1 %v583_v0  ;;  %447 = vmatpush3.bf16.msra.mxu0 %v484_v13 }
  0x32   :  { %448 = vmatprep.subr.bf16.mxu0 %v583_v0 }
  0x34   :  { %433 = vmatpush3.bf16.msra.mxu1 %v479_v8 }
  0x35   :  { %434 = vmatprep.subr.bf16.mxu1 %v583_v0  ;;  %449 = vmatpush3.bf16.msra.mxu0 %v485_v14 }
  0x36   :  { %450 = vmatprep.subr.bf16.mxu0 %v583_v0 }
  0x38   :  { %435 = vmatpush3.bf16.msra.mxu1 %v480_v9 }
  0x39   :  { %436 = vmatprep.subr.bf16.mxu1 %v583_v0  ;;  %451 = vmatpush3.bf16.msra.mxu0 %v486_v15 }
  0x3a   :  { %452 = vmatprep.subr.bf16.mxu0 %v583_v0 }
  0x3c   :  { %437 = vmatpush3.bf16.msra.mxu1 %v481_v10 }
  0x3d   :  { %438 = vmatprep.subr.bf16.mxu1 %v583_v0  ;;  %453 = vmatpush3.bf16.msra.mxu0 %v487_v16 }
  0x3e   :  { %454 = vmatprep.subr.bf16.mxu0 %v583_v0 }
  0x40   :  { %439 = vmatpush3.bf16.msra.mxu1 %v482_v11 }
  0x41   :  { %440 = vmatprep.subr.bf16.mxu1 %v583_v0  ;;  %455 = vmatpush3.bf16.msra.mxu0 %v488_v17 }
  0x42   :  { %456 = vmatprep.subr.bf16.mxu0 %v583_v0 }
  0x44   :  { %441 = vmatpush3.bf16.msra.mxu1 %v483_v12 }
  0x45   :  { %457 = vmatpush3.bf16.msra.mxu0 %v489_v18 }
  0x46   :  { %458 = vmatprep.subr.bf16.mxu0 %v583_v0 }
  0x49   :  { %459 = vmatpush3.bf16.msra.mxu0 %v490_v27 }
  0x4a   :  { %460 = vmatprep.subr.bf16.mxu0 %v583_v0 }
  0x4d   :  { %461 = vmatpush3.bf16.msra.mxu0 %v491_v28 }
  0xef   :  { %v121_v20 = vpop.f32.mrf.mxu0 }
  0xf0   :  { %v122_v21 = vadd.f32 %v373_v19, %v121_v20 }
  0xf1   :  { %v424_v22 = vpop.f32.mrf.mxu0 }
  0xf2   :  { %v127_v23 = vmax.f32 %v122_v21, 0.0 }
  0xf3   :  { %v124_v24 = vpop.f32.mrf.mxu0 }
  0xf4   :  { %v128_v25 = vpack.c.bf16 %v127_v23, %v127_v23 }
  0xf5   :  { %v425_v26 = vpop.f32.mrf.mxu0 }
  0xf6   :  { %443 = vmatmul.mubr.bf16.vlgmr.msra.gmra.mxu1 %v128_v25 }
 0x1b6   :  { %v235_v30 = vpop.f32.mrf.mxu1 }
 0x1b7   :  { %v236_v31 = vadd.f32 %v378_v29, %v235_v30 }
 0x1b8   :  { %v444_v32 = vpop.f32.mrf.mxu1 }
 0x1b9   :  { %v241_v33 = vmax.f32 %v236_v31, 0.0 }
 0x1ba   :  { %v238_v34 = vpop.f32.mrf.mxu1 }
 0x1bb   :  { %v242_v35 = vpack.c.bf16 %v241_v33, %v241_v33 }
 0x1bc   :  { %v445_v36 = vpop.f32.mrf.mxu1 }
 0x1bd   :  { %463 = vmatmul.mubr.bf16.vlgmr.msra.gmra.mxu0 %v242_v35 }
 0x27d   :  { %v350_v38 = vpop.f32.mrf.mxu0 }
 0x27e   :  { %v351_v39 = vadd.f32 %v388_v37, %v350_v38 }
 0x27f   :  { %v464_v40 = vpop.f32.mrf.mxu0 }
 0x280   :  { %356 = vst [vmem:[#allocation8] sm:$0xff] %v351_v39 }
 0x281   :  { %v353_v41 = vpop.f32.mrf.mxu0 }
 0x282   :  { %563 = shalt.err (!%p560_p5)
}
 0x283   :  { %366 = dma.vmem_to_hbm [thread:$0]  %s364_s10, 128, %s660_s4, [#allocation4]   ;;  %v465_v42 = vpop.f32.mrf.mxu0 }
 0x284   :  { %576 = dma.done.wait [#allocation4], 128  }
 0x285   :  { %577 = vsyncadd [#allocation4], 4294967168 }
 0x286   :  { %370 = vsyncpa [#allocation3], 1 }
 0x287   :  { %371 = vsyncpa [#allocation6], 1 }
 0x288   :  { %372 = vsyncpa [#allocation4], 1 }

</bundles_post_ra>
